<compile_context>
chip_gen: v6e
topology: v6e:2x2x1
jax: 0.10.0
libtpu: 0.0.40
codegen_flags: <defaults>
</compile_context>

<pallas_src>
import jax
import jax.numpy as jnp
from jax.experimental import pallas as pl
from jax.experimental.pallas import tpu as pltpu


def _causal_dilated_conv(h, w_ref, b_ref, *, K, dilation, mxu_dtype):
    """Dilated causal conv (Conv1d + Chomp1d) as one im2col MXU matmul.

    h      : (C_in, L) f32 activation value
    w_ref  : (C_out, K*C_in) weight ref, tap-major columns
             (tap j occupies columns [j*C_in, (j+1)*C_in))
    b_ref  : (C_out, 1) f32 bias ref
    returns: (C_out, L) f32 pre-activation
    """
    C, L = h.shape
    lane = jax.lax.broadcasted_iota(jnp.int32, (C, L), 1)
    taps = []
    for j in range(K):  # K is tiny & static -> unrolled
        s = (K - 1 - j) * dilation          # causal right-shift for this tap
        if s == 0:
            taps.append(h)
        else:
            shifted = pltpu.roll(h, shift=s, axis=1)          # XLU rotate (free slot)
            shifted = jnp.where(lane < s, 0.0, shifted)       # zero wrapped lanes
            taps.append(shifted)
    slab = jnp.concatenate(taps, axis=0)                      # (K*C, L)
    y = jnp.dot(w_ref[...].astype(mxu_dtype), slab.astype(mxu_dtype),
                preferred_element_type=jnp.float32)
    return y + b_ref[...]


def _make_tcn_kernel(*, K, dilations, has_downsample, L, mxu_dtype):
    """Build a kernel running the whole TCN stack for one batch element."""
    num_layers = len(dilations)

    def kernel(x_ref, *refs):
        out_ref = refs[-1]
        h = x_ref[0].astype(jnp.float32)          # (C_in, L), stays on-chip
        idx = 0
        for i in range(num_layers):
            d = dilations[i]
            w1, b1, w2, b2 = refs[idx:idx + 4]
            idx += 4
            if has_downsample[i]:
                wd, bd = refs[idx:idx + 2]
                idx += 2
            h_in = h
            # conv1 -> chomp -> ReLU
            h1 = jnp.maximum(
                _causal_dilated_conv(h_in, w1, b1, K=K, dilation=d,
                                     mxu_dtype=mxu_dtype), 0.0)
            # TODO(synk): Dropout layers are treated as identity (eval semantics).
            # conv2 -> chomp -> ReLU
            h2 = jnp.maximum(
                _causal_dilated_conv(h1, w2, b2, K=K, dilation=d,
                                     mxu_dtype=mxu_dtype), 0.0)
            # residual: 1x1 conv downsample, or identity (no matmul)
            if has_downsample[i]:
                res = jnp.dot(wd[...].astype(mxu_dtype), h_in.astype(mxu_dtype),
                              preferred_element_type=jnp.float32) + bd[...]
            else:
                res = h_in
            h = jnp.maximum(h2 + res, 0.0)
        out_ref[0] = h.astype(out_ref.dtype)

    return kernel


def tcn_forward(x, params, kernel_size, mxu_dtype=jnp.float32):
    """Run the full TemporalConvNet with one Pallas kernel.

    x: (N, C_in, L) f32.
    params: per layer (w1 (Co,Ci,K), b1 (Co,), w2 (Co,Co,K), b2 (Co,),
                       wd (Co,Ci) or None, bd (Co,) or None).
    mxu_dtype: dtype for MXU dot operands (use jnp.bfloat16 on v6e/v7x for
               larger channel counts); elementwise math is always f32.
    """
    N, C_in, L = x.shape
    K = kernel_size
    dilations = tuple(2 ** i for i in range(len(params)))
    has_ds = tuple(p[4] is not None for p in params)

    def im2col(w):  # (Co, Ci, K) -> (Co, K*Ci), tap-major columns
        Co, Ci, Kk = w.shape
        return jnp.transpose(w, (0, 2, 1)).reshape(Co, Kk * Ci).astype(mxu_dtype)

    flat = []
    in_specs = [pl.BlockSpec((1, C_in, L), lambda n: (n, 0, 0))]   # x
    for p in params:
        w1, b1, w2, b2, wd, bd = p
        arrs = [im2col(w1), b1[:, None].astype(jnp.float32),
                im2col(w2), b2[:, None].astype(jnp.float32)]
        if wd is not None:
            arrs += [wd.astype(mxu_dtype), bd[:, None].astype(jnp.float32)]
        for a in arrs:
            flat.append(a)
            # full-array (untiled) block, same for every grid step
            in_specs.append(pl.BlockSpec(a.shape, lambda n, nd=a.ndim: (0,) * nd))

    C_out = params[-1][0].shape[0]
    kernel = _make_tcn_kernel(K=K, dilations=dilations, has_downsample=has_ds,
                              L=L, mxu_dtype=mxu_dtype)
    return pl.pallas_call(
        kernel,
        out_shape=jax.ShapeDtypeStruct((N, C_out, L), jnp.float32),
        grid_spec=pltpu.PrefetchScalarGridSpec(
            num_scalar_prefetch=0,
            grid=(N,),
            in_specs=in_specs,
            out_specs=pl.BlockSpec((1, C_out, L), lambda n: (n, 0, 0)),
        ),
        compiler_params=pltpu.CompilerParams(
            dimension_semantics=("parallel",)),   # shards batch over v7x's 2 TCs
    )(x, *flat)


def init_tcn_params(key, num_inputs, num_channels, kernel_size):
    """Deterministic synthetic params mirroring TemporalConvNet.__init__ (PyTorch layout)."""
    params = []
    in_ch = num_inputs
    for out_ch in num_channels:
        key, k0, k1, k2, k3, k4, k5 = jax.random.split(key, 7)
        # weight_norm(Conv1d): w_eff = g * v / ||v||, with g initialized to ||v|| => w_eff == v
        v1 = 0.01 * jax.random.normal(k0, (out_ch, in_ch, kernel_size), jnp.float32)
        n1 = jnp.sqrt(jnp.sum(v1 ** 2, axis=(1, 2), keepdims=True))
        w1 = n1 * v1 / n1
        b1 = 0.05 * jax.random.normal(k1, (out_ch,), jnp.float32)

        v2 = 0.01 * jax.random.normal(k2, (out_ch, out_ch, kernel_size), jnp.float32)
        n2 = jnp.sqrt(jnp.sum(v2 ** 2, axis=(1, 2), keepdims=True))
        w2 = n2 * v2 / n2
        b2 = 0.05 * jax.random.normal(k3, (out_ch,), jnp.float32)

        if in_ch != out_ch:   # downsample = Conv1d(in, out, 1)
            wd = 0.01 * jax.random.normal(k4, (out_ch, in_ch), jnp.float32)
            bd = 0.05 * jax.random.normal(k5, (out_ch,), jnp.float32)
        else:                 # downsample is None -> identity residual
            wd, bd = None, None

        params.append((w1, b1, w2, b2, wd, bd))
        in_ch = out_ch
    return params


# ----------------------- pure-JAX reference (for checking) -----------------------
def _ref_causal_conv(x, w, b, dilation):
    K = w.shape[-1]
    L = x.shape[-1]
    pad = (K - 1) * dilation
    xp = jnp.pad(x, ((0, 0), (0, 0), (pad, 0)))
    out = jnp.zeros((x.shape[0], w.shape[0], L), jnp.float32) + b[None, :, None]
    for j in range(K):
        out = out + jnp.einsum('oi,nil->nol', w[:, :, j],
                               xp[:, :, j * dilation: j * dilation + L])
    return out


def _ref_block(x, p, dilation):
    w1, b1, w2, b2, wd, bd = p
    h1 = jax.nn.relu(_ref_causal_conv(x, w1, b1, dilation))
    h2 = jax.nn.relu(_ref_causal_conv(h1, w2, b2, dilation))
    res = x if wd is None else jnp.einsum('oi,nil->nol', wd, x) + bd[None, :, None]
    return jax.nn.relu(h2 + res)


def _ref_tcn(x, params):
    out = x
    for i, p in enumerate(params):
        out = _ref_block(out, p, dilation=2 ** i)
    return out


if __name__ == "__main__":
    N, num_inputs, L = 2, 8, 128
    num_channels = (16, 16)
    kernel_size = 3

    key = jax.random.PRNGKey(0)
    kx, kp = jax.random.split(key)
    x = jax.random.normal(kx, (N, num_inputs, L), jnp.float32)
    params = init_tcn_params(kp, num_inputs, num_channels, kernel_size)

    ref = _ref_tcn(x, params)

    # f32 MXU operands: conservative, matches the f32 reference tightly (v5e-safe).
    out = jax.block_until_ready(tcn_forward(x, params, kernel_size))
    assert out.shape == (N, num_channels[-1], L), out.shape
    assert jnp.allclose(out, ref, atol=1e-4, rtol=1e-4), "f32 kernel mismatch vs reference"

    # bf16 MXU operands (recommended on v6e/v7x); elementwise math stays f32.
    out_bf16 = jax.block_until_ready(
        tcn_forward(x, params, kernel_size, mxu_dtype=jnp.bfloat16))
    assert jnp.allclose(out_bf16, ref, atol=5e-3, rtol=5e-2), "bf16 kernel mismatch vs reference"

    print("KERNEL_OK")
</pallas_src>

<mosaic_0001>
module attributes {stable_mosaic.version = 11 : i64} {
  func.func @kernel(%arg0: i32, %arg1: memref<1x8x128xf32, #tpu.memory_space<vmem>>, %arg2: memref<16x24xf32, #tpu.memory_space<vmem>>, %arg3: memref<16x1xf32, #tpu.memory_space<vmem>>, %arg4: memref<16x48xf32, #tpu.memory_space<vmem>>, %arg5: memref<16x1xf32, #tpu.memory_space<vmem>>, %arg6: memref<16x8xf32, #tpu.memory_space<vmem>>, %arg7: memref<16x1xf32, #tpu.memory_space<vmem>>, %arg8: memref<16x48xf32, #tpu.memory_space<vmem>>, %arg9: memref<16x1xf32, #tpu.memory_space<vmem>>, %arg10: memref<16x48xf32, #tpu.memory_space<vmem>>, %arg11: memref<16x1xf32, #tpu.memory_space<vmem>>, %arg12: memref<1x16x128xf32, #tpu.memory_space<vmem>>) attributes {dimension_semantics = [#tpu.dimension_semantics<parallel>], iteration_bounds = array<i64: 2>, scalar_prefetch = 0 : i64, scratch_operands = 0 : i64, tpu.core_type = #tpu.core_type<tc>, window_params = [{transform_indices = @transform_0, window_bounds = array<i64: 1, 8, 128>}, {pipeline_mode = #tpu.pipeline_mode<synchronous>, transform_indices = @transform_1, window_bounds = array<i64: 16, 24>}, {pipeline_mode = #tpu.pipeline_mode<synchronous>, transform_indices = @transform_2, window_bounds = array<i64: 16, 1>}, {pipeline_mode = #tpu.pipeline_mode<synchronous>, transform_indices = @transform_3, window_bounds = array<i64: 16, 48>}, {pipeline_mode = #tpu.pipeline_mode<synchronous>, transform_indices = @transform_4, window_bounds = array<i64: 16, 1>}, {pipeline_mode = #tpu.pipeline_mode<synchronous>, transform_indices = @transform_5, window_bounds = array<i64: 16, 8>}, {pipeline_mode = #tpu.pipeline_mode<synchronous>, transform_indices = @transform_6, window_bounds = array<i64: 16, 1>}, {pipeline_mode = #tpu.pipeline_mode<synchronous>, transform_indices = @transform_7, window_bounds = array<i64: 16, 48>}, {pipeline_mode = #tpu.pipeline_mode<synchronous>, transform_indices = @transform_8, window_bounds = array<i64: 16, 1>}, {pipeline_mode = #tpu.pipeline_mode<synchronous>, transform_indices = @transform_9, window_bounds = array<i64: 16, 48>}, {pipeline_mode = #tpu.pipeline_mode<synchronous>, transform_indices = @transform_10, window_bounds = array<i64: 16, 1>}, {transform_indices = @transform_11, window_bounds = array<i64: 1, 16, 128>}]} {
    %c0 = arith.constant 0 : index
    %c0_0 = arith.constant 0 : index
    %c0_1 = arith.constant 0 : index
    %0 = vector.load %arg1[%c0, %c0_0, %c0_1] : memref<1x8x128xf32, #tpu.memory_space<vmem>>, vector<1x8x128xf32>
    %1 = vector.shape_cast %0 : vector<1x8x128xf32> to vector<8x128xf32>
    %2 = tpu.iota {dimensions = array<i32: 1>} : vector<8x128xi32>
    %c2_i32 = arith.constant 2 : i32
    %3 = tpu.dynamic_rotate %1 by %c2_i32 dim 1 : vector<8x128xf32>, i32 -> vector<8x128xf32>
    %c2_i32_2 = arith.constant 2 : i32
    %4 = vector.broadcast %c2_i32_2 : i32 to vector<8x128xi32>
    %5 = arith.cmpi slt, %2, %4 : vector<8x128xi32>
    %cst = arith.constant 0.000000e+00 : f32
    %6 = vector.broadcast %cst : f32 to vector<8x128xf32>
    %7 = arith.select %5, %6, %3 : vector<8x128xi1>, vector<8x128xf32>
    %c1_i32 = arith.constant 1 : i32
    %8 = tpu.dynamic_rotate %1 by %c1_i32 dim 1 : vector<8x128xf32>, i32 -> vector<8x128xf32>
    %c1_i32_3 = arith.constant 1 : i32
    %9 = vector.broadcast %c1_i32_3 : i32 to vector<8x128xi32>
    %10 = arith.cmpi slt, %2, %9 : vector<8x128xi32>
    %cst_4 = arith.constant 0.000000e+00 : f32
    %11 = vector.broadcast %cst_4 : f32 to vector<8x128xf32>
    %12 = arith.select %10, %11, %8 : vector<8x128xi1>, vector<8x128xf32>
    %13 = tpu.concatenate %7, %12, %1 in 0 : vector<8x128xf32>, vector<8x128xf32>, vector<8x128xf32> -> vector<24x128xf32>
    %c0_5 = arith.constant 0 : index
    %c0_6 = arith.constant 0 : index
    %14 = vector.load %arg2[%c0_5, %c0_6] : memref<16x24xf32, #tpu.memory_space<vmem>>, vector<16x24xf32>
    %cst_7 = arith.constant dense<0.000000e+00> : vector<16x128xf32>
    %15 = tpu.matmul %14, %13, %cst_7 {dimension_numbers = #tpu.dot_dimension_numbers<[1], [0], [0], [1], [0, 0, 1, 1], [], []>} : vector<16x24xf32>, vector<24x128xf32>, vector<16x128xf32> -> vector<16x128xf32>
    %c0_8 = arith.constant 0 : index
    %c0_9 = arith.constant 0 : index
    %16 = vector.load %arg3[%c0_8, %c0_9] : memref<16x1xf32, #tpu.memory_space<vmem>>, vector<16x1xf32>
    %17 = vector.broadcast %16 : vector<16x1xf32> to vector<16x128xf32>
    %18 = arith.addf %15, %17 : vector<16x128xf32>
    %cst_10 = arith.constant 0.000000e+00 : f32
    %19 = vector.broadcast %cst_10 : f32 to vector<16x128xf32>
    %20 = arith.maximumf %18, %19 : vector<16x128xf32>
    %21 = tpu.iota {dimensions = array<i32: 1>} : vector<16x128xi32>
    %c2_i32_11 = arith.constant 2 : i32
    %22 = tpu.dynamic_rotate %20 by %c2_i32_11 dim 1 : vector<16x128xf32>, i32 -> vector<16x128xf32>
    %c2_i32_12 = arith.constant 2 : i32
    %23 = vector.broadcast %c2_i32_12 : i32 to vector<16x128xi32>
    %24 = arith.cmpi slt, %21, %23 : vector<16x128xi32>
    %cst_13 = arith.constant 0.000000e+00 : f32
    %25 = vector.broadcast %cst_13 : f32 to vector<16x128xf32>
    %26 = arith.select %24, %25, %22 : vector<16x128xi1>, vector<16x128xf32>
    %c1_i32_14 = arith.constant 1 : i32
    %27 = tpu.dynamic_rotate %20 by %c1_i32_14 dim 1 : vector<16x128xf32>, i32 -> vector<16x128xf32>
    %c1_i32_15 = arith.constant 1 : i32
    %28 = vector.broadcast %c1_i32_15 : i32 to vector<16x128xi32>
    %29 = arith.cmpi slt, %21, %28 : vector<16x128xi32>
    %cst_16 = arith.constant 0.000000e+00 : f32
    %30 = vector.broadcast %cst_16 : f32 to vector<16x128xf32>
    %31 = arith.select %29, %30, %27 : vector<16x128xi1>, vector<16x128xf32>
    %32 = tpu.concatenate %26, %31, %20 in 0 : vector<16x128xf32>, vector<16x128xf32>, vector<16x128xf32> -> vector<48x128xf32>
    %c0_17 = arith.constant 0 : index
    %c0_18 = arith.constant 0 : index
    %33 = vector.load %arg4[%c0_17, %c0_18] : memref<16x48xf32, #tpu.memory_space<vmem>>, vector<16x48xf32>
    %cst_19 = arith.constant dense<0.000000e+00> : vector<16x128xf32>
    %34 = tpu.matmul %33, %32, %cst_19 {dimension_numbers = #tpu.dot_dimension_numbers<[1], [0], [0], [1], [0, 0, 1, 1], [], []>} : vector<16x48xf32>, vector<48x128xf32>, vector<16x128xf32> -> vector<16x128xf32>
    %c0_20 = arith.constant 0 : index
    %c0_21 = arith.constant 0 : index
    %35 = vector.load %arg5[%c0_20, %c0_21] : memref<16x1xf32, #tpu.memory_space<vmem>>, vector<16x1xf32>
    %36 = vector.broadcast %35 : vector<16x1xf32> to vector<16x128xf32>
    %37 = arith.addf %34, %36 : vector<16x128xf32>
    %cst_22 = arith.constant 0.000000e+00 : f32
    %38 = vector.broadcast %cst_22 : f32 to vector<16x128xf32>
    %39 = arith.maximumf %37, %38 : vector<16x128xf32>
    %c0_23 = arith.constant 0 : index
    %c0_24 = arith.constant 0 : index
    %40 = vector.load %arg6[%c0_23, %c0_24] : memref<16x8xf32, #tpu.memory_space<vmem>>, vector<16x8xf32>
    %cst_25 = arith.constant dense<0.000000e+00> : vector<16x128xf32>
    %41 = tpu.matmul %40, %1, %cst_25 {dimension_numbers = #tpu.dot_dimension_numbers<[1], [0], [0], [1], [0, 0, 1, 1], [], []>} : vector<16x8xf32>, vector<8x128xf32>, vector<16x128xf32> -> vector<16x128xf32>
    %c0_26 = arith.constant 0 : index
    %c0_27 = arith.constant 0 : index
    %42 = vector.load %arg7[%c0_26, %c0_27] : memref<16x1xf32, #tpu.memory_space<vmem>>, vector<16x1xf32>
    %43 = vector.broadcast %42 : vector<16x1xf32> to vector<16x128xf32>
    %44 = arith.addf %41, %43 : vector<16x128xf32>
    %45 = arith.addf %39, %44 : vector<16x128xf32>
    %cst_28 = arith.constant 0.000000e+00 : f32
    %46 = vector.broadcast %cst_28 : f32 to vector<16x128xf32>
    %47 = arith.maximumf %45, %46 : vector<16x128xf32>
    %48 = tpu.iota {dimensions = array<i32: 1>} : vector<16x128xi32>
    %c4_i32 = arith.constant 4 : i32
    %49 = tpu.dynamic_rotate %47 by %c4_i32 dim 1 : vector<16x128xf32>, i32 -> vector<16x128xf32>
    %c4_i32_29 = arith.constant 4 : i32
    %50 = vector.broadcast %c4_i32_29 : i32 to vector<16x128xi32>
    %51 = arith.cmpi slt, %48, %50 : vector<16x128xi32>
    %cst_30 = arith.constant 0.000000e+00 : f32
    %52 = vector.broadcast %cst_30 : f32 to vector<16x128xf32>
    %53 = arith.select %51, %52, %49 : vector<16x128xi1>, vector<16x128xf32>
    %c2_i32_31 = arith.constant 2 : i32
    %54 = tpu.dynamic_rotate %47 by %c2_i32_31 dim 1 : vector<16x128xf32>, i32 -> vector<16x128xf32>
    %c2_i32_32 = arith.constant 2 : i32
    %55 = vector.broadcast %c2_i32_32 : i32 to vector<16x128xi32>
    %56 = arith.cmpi slt, %48, %55 : vector<16x128xi32>
    %cst_33 = arith.constant 0.000000e+00 : f32
    %57 = vector.broadcast %cst_33 : f32 to vector<16x128xf32>
    %58 = arith.select %56, %57, %54 : vector<16x128xi1>, vector<16x128xf32>
    %59 = tpu.concatenate %53, %58, %47 in 0 : vector<16x128xf32>, vector<16x128xf32>, vector<16x128xf32> -> vector<48x128xf32>
    %c0_34 = arith.constant 0 : index
    %c0_35 = arith.constant 0 : index
    %60 = vector.load %arg8[%c0_34, %c0_35] : memref<16x48xf32, #tpu.memory_space<vmem>>, vector<16x48xf32>
    %cst_36 = arith.constant dense<0.000000e+00> : vector<16x128xf32>
    %61 = tpu.matmul %60, %59, %cst_36 {dimension_numbers = #tpu.dot_dimension_numbers<[1], [0], [0], [1], [0, 0, 1, 1], [], []>} : vector<16x48xf32>, vector<48x128xf32>, vector<16x128xf32> -> vector<16x128xf32>
    %c0_37 = arith.constant 0 : index
    %c0_38 = arith.constant 0 : index
    %62 = vector.load %arg9[%c0_37, %c0_38] : memref<16x1xf32, #tpu.memory_space<vmem>>, vector<16x1xf32>
    %63 = vector.broadcast %62 : vector<16x1xf32> to vector<16x128xf32>
    %64 = arith.addf %61, %63 : vector<16x128xf32>
    %cst_39 = arith.constant 0.000000e+00 : f32
    %65 = vector.broadcast %cst_39 : f32 to vector<16x128xf32>
    %66 = arith.maximumf %64, %65 : vector<16x128xf32>
    %67 = tpu.iota {dimensions = array<i32: 1>} : vector<16x128xi32>
    %c4_i32_40 = arith.constant 4 : i32
    %68 = tpu.dynamic_rotate %66 by %c4_i32_40 dim 1 : vector<16x128xf32>, i32 -> vector<16x128xf32>
    %c4_i32_41 = arith.constant 4 : i32
    %69 = vector.broadcast %c4_i32_41 : i32 to vector<16x128xi32>
    %70 = arith.cmpi slt, %67, %69 : vector<16x128xi32>
    %cst_42 = arith.constant 0.000000e+00 : f32
    %71 = vector.broadcast %cst_42 : f32 to vector<16x128xf32>
    %72 = arith.select %70, %71, %68 : vector<16x128xi1>, vector<16x128xf32>
    %c2_i32_43 = arith.constant 2 : i32
    %73 = tpu.dynamic_rotate %66 by %c2_i32_43 dim 1 : vector<16x128xf32>, i32 -> vector<16x128xf32>
    %c2_i32_44 = arith.constant 2 : i32
    %74 = vector.broadcast %c2_i32_44 : i32 to vector<16x128xi32>
    %75 = arith.cmpi slt, %67, %74 : vector<16x128xi32>
    %cst_45 = arith.constant 0.000000e+00 : f32
    %76 = vector.broadcast %cst_45 : f32 to vector<16x128xf32>
    %77 = arith.select %75, %76, %73 : vector<16x128xi1>, vector<16x128xf32>
    %78 = tpu.concatenate %72, %77, %66 in 0 : vector<16x128xf32>, vector<16x128xf32>, vector<16x128xf32> -> vector<48x128xf32>
    %c0_46 = arith.constant 0 : index
    %c0_47 = arith.constant 0 : index
    %79 = vector.load %arg10[%c0_46, %c0_47] : memref<16x48xf32, #tpu.memory_space<vmem>>, vector<16x48xf32>
    %cst_48 = arith.constant dense<0.000000e+00> : vector<16x128xf32>
    %80 = tpu.matmul %79, %78, %cst_48 {dimension_numbers = #tpu.dot_dimension_numbers<[1], [0], [0], [1], [0, 0, 1, 1], [], []>} : vector<16x48xf32>, vector<48x128xf32>, vector<16x128xf32> -> vector<16x128xf32>
    %c0_49 = arith.constant 0 : index
    %c0_50 = arith.constant 0 : index
    %81 = vector.load %arg11[%c0_49, %c0_50] : memref<16x1xf32, #tpu.memory_space<vmem>>, vector<16x1xf32>
    %82 = vector.broadcast %81 : vector<16x1xf32> to vector<16x128xf32>
    %83 = arith.addf %80, %82 : vector<16x128xf32>
    %cst_51 = arith.constant 0.000000e+00 : f32
    %84 = vector.broadcast %cst_51 : f32 to vector<16x128xf32>
    %85 = arith.maximumf %83, %84 : vector<16x128xf32>
    %86 = arith.addf %85, %47 : vector<16x128xf32>
    %cst_52 = arith.constant 0.000000e+00 : f32
    %87 = vector.broadcast %cst_52 : f32 to vector<16x128xf32>
    %88 = arith.maximumf %86, %87 : vector<16x128xf32>
    %c0_53 = arith.constant 0 : index
    %c0_54 = arith.constant 0 : index
    %c0_55 = arith.constant 0 : index
    %89 = vector.load %arg12[%c0_53, %c0_54, %c0_55] : memref<1x16x128xf32, #tpu.memory_space<vmem>>, vector<1x16x128xf32>
    %90 = vector.shape_cast %89 : vector<1x16x128xf32> to vector<16x128xf32>
    %91 = vector.shape_cast %88 : vector<16x128xf32> to vector<1x16x128xf32>
    tpu.vector_store %arg12[%c0_53, %c0_54, %c0_55], %91 {strides = array<i32>} : memref<1x16x128xf32, #tpu.memory_space<vmem>>, vector<1x16x128xf32>,
    return
  }
  func.func @transform_0(%arg0: i32) -> (i32, i32, i32) {
    %c0_i32 = arith.constant 0 : i32
    %c0_i32_0 = arith.constant 0 : i32
    %c0_i32_1 = arith.constant 0 : i32
    return %arg0, %c0_i32, %c0_i32_0 : i32, i32, i32
  }
  func.func @transform_1(%arg0: i32) -> (i32, i32) {
    %c0_i32 = arith.constant 0 : i32
    %c0_i32_0 = arith.constant 0 : i32
    %c0_i32_1 = arith.constant 0 : i32
    return %c0_i32, %c0_i32_0 : i32, i32
  }
  func.func @transform_2(%arg0: i32) -> (i32, i32) {
    %c0_i32 = arith.constant 0 : i32
    %c0_i32_0 = arith.constant 0 : i32
    %c0_i32_1 = arith.constant 0 : i32
    return %c0_i32, %c0_i32_0 : i32, i32
  }
  func.func @transform_3(%arg0: i32) -> (i32, i32) {
    %c0_i32 = arith.constant 0 : i32
    %c0_i32_0 = arith.constant 0 : i32
    %c0_i32_1 = arith.constant 0 : i32
    return %c0_i32, %c0_i32_0 : i32, i32
  }
  func.func @transform_4(%arg0: i32) -> (i32, i32) {
    %c0_i32 = arith.constant 0 : i32
    %c0_i32_0 = arith.constant 0 : i32
    %c0_i32_1 = arith.constant 0 : i32
    return %c0_i32, %c0_i32_0 : i32, i32
  }
  func.func @transform_5(%arg0: i32) -> (i32, i32) {
    %c0_i32 = arith.constant 0 : i32
    %c0_i32_0 = arith.constant 0 : i32
    %c0_i32_1 = arith.constant 0 : i32
    return %c0_i32, %c0_i32_0 : i32, i32
  }
  func.func @transform_6(%arg0: i32) -> (i32, i32) {
    %c0_i32 = arith.constant 0 : i32
    %c0_i32_0 = arith.constant 0 : i32
    %c0_i32_1 = arith.constant 0 : i32
    return %c0_i32, %c0_i32_0 : i32, i32
  }
  func.func @transform_7(%arg0: i32) -> (i32, i32) {
    %c0_i32 = arith.constant 0 : i32
    %c0_i32_0 = arith.constant 0 : i32
    %c0_i32_1 = arith.constant 0 : i32
    return %c0_i32, %c0_i32_0 : i32, i32
  }
  func.func @transform_8(%arg0: i32) -> (i32, i32) {
    %c0_i32 = arith.constant 0 : i32
    %c0_i32_0 = arith.constant 0 : i32
    %c0_i32_1 = arith.constant 0 : i32
    return %c0_i32, %c0_i32_0 : i32, i32
  }
  func.func @transform_9(%arg0: i32) -> (i32, i32) {
    %c0_i32 = arith.constant 0 : i32
    %c0_i32_0 = arith.constant 0 : i32
    %c0_i32_1 = arith.constant 0 : i32
    return %c0_i32, %c0_i32_0 : i32, i32
  }
  func.func @transform_10(%arg0: i32) -> (i32, i32) {
    %c0_i32 = arith.constant 0 : i32
    %c0_i32_0 = arith.constant 0 : i32
    %c0_i32_1 = arith.constant 0 : i32
    return %c0_i32, %c0_i32_0 : i32, i32
  }
  func.func @transform_11(%arg0: i32) -> (i32, i32, i32) {
    %c0_i32 = arith.constant 0 : i32
    %c0_i32_0 = arith.constant 0 : i32
    %c0_i32_1 = arith.constant 0 : i32
    return %arg0, %c0_i32, %c0_i32_0 : i32, i32, i32
  }
}

</mosaic_0001>

<bundles_post_ra>
// kernel: tpu_custom_call.1
= control target key start
LH: loop header
LB: loop body
LE: loop exit
PB: predicated region body
PF: predicated region fallthrough
CT: control target
= control target key end

     0   :  { %s1581_s0 = inlined_call_operand.vmem [shape: f32[2,8,128], index: 0, kind: input, shape index: {}]   ;;  %s1582_s1 = inlined_call_operand.vmem [shape: f32[16,24], index: 1, kind: input, shape index: {}]   ;;  %s1583_s2 = inlined_call_operand.vmem [shape: f32[16,1], index: 2, kind: input, shape index: {}]   ;;  %s1584_s3 = inlined_call_operand.vmem [shape: f32[16,48], index: 3, kind: input, shape index: {}]   ;;  %s1585_s4 = inlined_call_operand.vmem [shape: f32[16,1], index: 4, kind: input, shape index: {}]   ;;  %s1586_s5 = inlined_call_operand.vmem [shape: f32[16,8], index: 5, kind: input, shape index: {}]   ;;  %s1587_s6 = inlined_call_operand.vmem [shape: f32[16,1], index: 6, kind: input, shape index: {}]   ;;  %s1588_s7 = inlined_call_operand.vmem [shape: f32[16,48], index: 7, kind: input, shape index: {}]   ;;  %s1589_s8 = inlined_call_operand.vmem [shape: f32[16,1], index: 8, kind: input, shape index: {}]   ;;  %s1590_s9 = inlined_call_operand.vmem [shape: f32[16,48], index: 9, kind: input, shape index: {}]   ;;  %s1591_s10 = inlined_call_operand.vmem [shape: f32[16,1], index: 10, kind: input, shape index: {}]   ;;  %s1592_s11 = inlined_call_operand.hbm [shape: f32[2,16,128], index: 11, kind: output, shape index: {}]  }
   0x1   :  { %1593 = sst [smem:[#allocation5_spill]] %s1581_s0 }
   0x2   :  { %16 = vsyncpa [#allocation3], 0 }
   0x3   :  { %18 = vsyncpa [#allocation3 + $0x1], 0  ;;  %s1322_s17 = smov 0   ;;  %s1324_s18 = smov 0  }
   0x4   :  { %s1326_s19 = smov 0   ;;  %s1328_s20 = smov 0  }
   0x5 LB: > { %s1343_s21 = sadd.s32 4294967295, %s1253_s20   ;;  %s1002_s22 = sadd.s32 4294967294, %s1253_s20   ;;  %s1253_s20 = sphi %s1328_s20, %s1600_s20   ;;  %s1249_s19 = sphi %s1326_s19, %s1599_s19   ;;  %s1245_s18 = sphi %s1324_s18, %s1598_s18   ;;  %s1241_s17 = sphi %s1322_s17, %s1597_s17  }
   0x6   : > { %s1347_s23 = sadd.s32 1, %s1253_s20   ;;  %s267_s24 = sadd.s32 1, %s1249_s19 }
   0x7   : > { %s264_s25 = ssub.s32 %s1253_s20, %s1347_s23  ;;  %p277_p0 = scmp.ne.s32.totalorder %s1249_s19, %s1245_s18 }
   0x8   : > { %p265_p1 = scmp.eq.s32.totalorder %s264_s25, 0  ;;  %p278_p2 = scmp.eq.s32.totalorder %s1343_s21, 1 }
   0x9   : > { %p283_p3 = scmp.ne.s32.totalorder %s1245_s18, %s1241_s17  ;;  %p284_p4 = scmp.eq.s32.totalorder %s1002_s22, 1 }
   0xa   : > { %s1358_s26 = scalar_select %p265_p1, %s1249_s19, %s267_s24  }
   0xb   : > { %p1360_p5 = por %p278_p2, %p277_p0  ;;  %p1364_p6 = por %p284_p4, %p283_p3 }
   0xc   : > { %p1005_p7 = scmp.ge.s32.totalorder %s1253_s20, 1  ;;  %p339_p8 = scmp.lt.s32.totalorder %s1253_s20, 3 }
   0xe   : > { %p340_p9 = pnand %p1005_p7, %p339_p8 }
   0xf   : > { %p378_p10 = scmp.lt.s32.totalorder (!%p340_p9), %s1343_s21, 1  ;;  %s1596_s0 = sld [smem:[#allocation5_spill]] (!%p340_p9) }
  0x10   : > { %343 = sbr.rel (%p340_p9) target bundleno = 1328 (0x530), region = 64  ;;  %s1256_s30 = smov (!%p340_p9), 1  }
  0x11   : > { %s1257_s12 = smov (!%p340_p9), 2   ;;  %s1258_s16 = smov (!%p340_p9), 4  }
  0x15   : > { %v393_v0 = vld [vmem:[%s1582_s1] sm:$0xff]  ;;  %vm407_vm0 = vcmask 195584   ;;  %v1255_v1 = vmov 0   ;;  %v396_v2 = vld [vmem:[%s1583_s2 + $0x8] sm:$0xff]  ;;  %s379_s14 = scalar_select %p378_p10, %s1343_s21, 1  ;;  %v383_v5 = vlaneseq  ;;  %vm615_vm3 = vcmask 64512  }
  0x16   : > { %1093 = vmatprep.mubr.msk.f32.mxu0 %vm407_vm0, %v393_v0  ;;  %1191 = vset.pattern.permute.xlu1 %v1255_v1  ;;  %v395_v3 = vld [vmem:[%s1583_s2] sm:$0xff]  ;;  %v394_v9 = vld [vmem:[%s1582_s1 + $0x8] sm:$0xff]  ;;  %vm517_vm4 = vcmask 392192  }
  0x17   : > { %404 = vperm.xlu1 %1191, %v396_v2   ;;  %1192 = vset.pattern.permute.xlu0 %v1255_v1  ;;  %s1007_s22 = sshll.u32 %s379_s14, 3  ;;  %v1387_v6 = vand.u32 127, %v383_v5  ;;  %v601_v10 = vld [vmem:[%s1586_s5] sm:$0xff]  ;;  %v602_v11 = vld [vmem:[%s1586_s5 + $0x8] sm:$0xff] }
  0x18   : > { %s381_s29 = scalar_lea.vmem %s1596_s0, %s1007_s22  ;;  %v503_v13 = vld [vmem:[%s1584_s3] sm:$0xff]  ;;  %v506_v22 = vld [vmem:[%s1585_s4 + $0x8] sm:$0xff]  ;;  %s1051_s22 = sshll.u32 %s1343_s21, 8 }
  0x19   : > { %v382_v4 = vld [vmem:[%s381_s29] sm:$0xff]  ;;  %vm1052_vm1 = vcmp.ge.s32.totalorder %v1387_v6, 1  ;;  %vm1053_vm2 = vcmp.ge.s32.totalorder %v1387_v6, 2  ;;  %1108 = vmatprep.mubr.msk.f32.mxu1 %vm517_vm4, %v503_v13  ;;  %v604_v23 = vld [vmem:[%s1587_s6 + $0x8] sm:$0xff]  ;;  %vm1054_vm5 = vcmp.ge.s32.totalorder %v1387_v6, 4  ;;  %s375_s29 = sand.u32 1, %s1245_s18   ;;  %s1539_s25 = scalar_lea.hbm %s1592_s11, %s1051_s22 }
  0x1a   : > { %389 = vrot.lane.b32.xlu0 %v382_v4, %s1256_s30  ;;  %1087 = vmatprep.subr.mxu0 %v382_v4  ;;  %v505_v21 = vld [vmem:[%s1585_s4] sm:$0xff]  ;;  %v504_v29 = vld [vmem:[%s1584_s3 + $0x8] sm:$0xff]  ;;  %s1006_s13 = sshll.u32 %s375_s29, 4  ;;  %s1259_s21 = smov [#allocation2]  }
  0x1b   : > { %399 = vperm.xlu1 %1191, %v395_v3   ;;  %1088 = vmatpush3.msra.mxu0 %v382_v4  ;;  %v603_v24 = vld [vmem:[%s1587_s6] sm:$0xff]  ;;  %v717_v49 = vld [vmem:[%s1589_s8 + $0x8] sm:$0xff]  ;;  %s377_s14 = scalar_lea.vmem [#allocation2], %s1006_s13  ;;  %s1197_s13 = sshll.u32 %s1259_s21, 4  ;;  %s1198_s13 = int_to_ptr.vmem [resolvable:$false] %s1197_s13 }
  0x1c   : > { %v714_v39 = vld [vmem:[%s1588_s7] sm:$0xff]  ;;  %v715_v55 = vld [vmem:[%s1588_s7 + $0x8] sm:$0xff]  ;;  %s940_s15 = sshll.u32 %s377_s14, 4  ;;  %s1199_s0 = scalar_lea.vmem %s1198_s13, 512  ;;  %s1534_s15 = int_to_ptr.vmem [resolvable:$true] %s940_s15 }
  0x1d   : > { %v716_v50 = vld [vmem:[%s1589_s8] sm:$0xff]  ;;  %v826_v2 = vld [vmem:[%s1591_s10 + $0x8] sm:$0xff]  ;;  %p1200_p0 = scmp.lt.s32.totalorder %s1534_s15, %s1198_s13 }
  0x1e   : > { %385 = vrot.lane.b32.xlu0 %v382_v4, %s1257_s12  ;;  %v823_v56 = vld [vmem:[%s1590_s9] sm:$0xff] }
  0x1f   : > { %v825_v1 = vld [vmem:[%s1591_s10] sm:$0xff] }
  0x8c   : > { %v390_v7 = vpop.permute.xlu0 %389 }
  0x8d   : > { %1089 = vmatprep.subr.msk.mxu0 %vm1052_vm1, %v390_v7 }
  0x8e   : > { %1090 = vmatpush3.msk.msra.mxu0 %vm1052_vm1, %v390_v7 }
  0x90   : > { %v386_v8 = vpop.permute.xlu0 %385 }
  0x91   : > { %1091 = vmatprep.subr.msk.mxu0 %vm1053_vm2, %v386_v8 }
  0x92   : > { %1092 = vmatpush3.msk.msra.mxu0 %vm1053_vm2, %v386_v8  ;;  %v405_v12 = vpop.permute.xlu1 %404  ;;  %v824_v8 = vld [vmem:[%s1590_s9 + $0x8] sm:$0xff] }
  0x93   : > { %1094 = vmatmul.mubr.msk.f32.vlgmr.msra.gmra.mxu0 %vm407_vm0, %v394_v9  ;;  %1111 = vmatprep.subr.mxu0 %v382_v4 }
  0x94   : > { %1112 = vmatpush3.msra.mxu0 %v382_v4  ;;  %1113 = vmatprep.mubr.msk.f32.mxu0 %vm615_vm3, %v601_v10 }
  0x96   : > { %v400_v16 = vpop.permute.xlu1 %399 }
  0x97   : > { %1114 = vmatmul.mubr.msk.f32.vlgmr.msra.gmra.mxu0 %vm615_vm3, %v602_v11 }
  0x98   : > { %1128 = vmatprep.mubr.msk.f32.mxu0 %vm517_vm4, %v714_v39 }
 0x153   : > { %v1095_v14 = vpop.f32.mrf.mxu0 }
 0x154   : > { %v486_v15 = vadd.f32 %v1095_v14, %v405_v12 }
 0x155   : > { %v480_v17 = vpop.f32.mrf.mxu0 }
 0x156   : > { %v490_v18 = vmax.f32 %v486_v15, 0.0  ;;  %v481_v19 = vadd.f32 %v480_v17, %v400_v16 }
 0x157   : > { %v1115_v32 = vpop.f32.mrf.mxu0 }
 0x158   : > { %v489_v20 = vmax.f32 %v481_v19, 0.0  ;;  %499 = vrot.lane.b32.xlu0 %v490_v18, %s1256_s30  ;;  %1096 = vmatprep.subr.mxu1 %v490_v18 }
 0x159   : > { %1097 = vmatpush3.msra.mxu1 %v490_v18  ;;  %v688_v37 = vpop.f32.mrf.mxu0 }
 0x15a   : > { %497 = vrot.lane.b32.xlu1 %v489_v20, %s1256_s30  ;;  %1098 = vmatprep.subr.mxu1 %v489_v20 }
 0x15b   : > { %1099 = vmatpush3.msra.mxu1 %v489_v20 }
 0x15c   : > { %493 = vrot.lane.b32.xlu0 %v490_v18, %s1257_s12 }
 0x15e   : > { %491 = vrot.lane.b32.xlu1 %v489_v20, %s1257_s12 }
 0x160   : > { %514 = vperm.xlu0 %1192, %v506_v22  }
 0x162   : > { %509 = vperm.xlu1 %1191, %v505_v21  }
 0x164   : > { %607 = vperm.xlu0 %1192, %v603_v24  }
 0x166   : > { %612 = vperm.xlu1 %1191, %v604_v23  }
 0x1ca   : > { %v500_v25 = vpop.permute.xlu0 %499 }
 0x1cb   : > { %1100 = vmatprep.subr.msk.mxu1 %vm1052_vm1, %v500_v25 }
 0x1cc   : > { %v498_v26 = vpop.permute.xlu1 %497  ;;  %1101 = vmatpush3.msk.msra.mxu1 %vm1052_vm1, %v500_v25 }
 0x1cd   : > { %1102 = vmatprep.subr.msk.mxu1 %vm1052_vm1, %v498_v26 }
 0x1ce   : > { %v494_v27 = vpop.permute.xlu0 %493  ;;  %1103 = vmatpush3.msk.msra.mxu1 %vm1052_vm1, %v498_v26 }
 0x1cf   : > { %1104 = vmatprep.subr.msk.mxu1 %vm1053_vm2, %v494_v27 }
 0x1d0   : > { %v492_v28 = vpop.permute.xlu1 %491  ;;  %1105 = vmatpush3.msk.msra.mxu1 %vm1053_vm2, %v494_v27 }
 0x1d1   : > { %1106 = vmatprep.subr.msk.mxu1 %vm1053_vm2, %v492_v28 }
 0x1d2   : > { %1107 = vmatpush3.msk.msra.mxu1 %vm1053_vm2, %v492_v28 }
 0x1d3   : > { %1109 = vmatmul.mubr.msk.f32.vlgmr.msra.gmra.mxu1 %vm517_vm4, %v504_v29 }
 0x1d4   : > { %1143 = vmatprep.mubr.msk.f32.mxu1 %vm517_vm4, %v823_v56 }
 0x1db   : > { %v515_v31 = vpop.permute.xlu0 %514 }
 0x1dd   : > { %v510_v30 = vpop.permute.xlu1 %509 }
 0x1df   : > { %v608_v35 = vpop.permute.xlu0 %607 }
 0x1e0   : > { %v689_v44 = vadd.f32 %v688_v37, %v608_v35 }
 0x1e1   : > { %v613_v33 = vpop.permute.xlu1 %612 }
 0x1e2   : > { %v694_v40 = vadd.f32 %v1115_v32, %v613_v33 }
 0x293   : > { %v1110_v34 = vpop.f32.mrf.mxu1 }
 0x294   : > { %v596_v36 = vadd.f32 %v1110_v34, %v515_v31 }
 0x295   : > { %v590_v38 = vpop.f32.mrf.mxu1 }
 0x296   : > { %v600_v41 = vmax.f32 %v596_v36, 0.0  ;;  %v591_v42 = vadd.f32 %v590_v38, %v510_v30 }
 0x298   : > { %v698_v43 = vadd.f32 %v694_v40, %v600_v41  ;;  %v599_v45 = vmax.f32 %v591_v42, 0.0 }
 0x29a   : > { %v1453_v46 = vmax.f32 %v698_v43, 0.0  ;;  %v697_v47 = vadd.f32 %v689_v44, %v599_v45 }
 0x29c   : > { %v1455_v48 = vmax.f32 %v697_v47, 0.0  ;;  %710 = vrot.lane.b32.xlu1 %v1453_v46, %s1257_s12  ;;  %1116 = vmatprep.subr.mxu0 %v1453_v46 }
 0x29d   : > { %1117 = vmatpush3.msra.mxu0 %v1453_v46 }
 0x29e   : > { %708 = vrot.lane.b32.xlu0 %v1455_v48, %s1257_s12  ;;  %1118 = vmatprep.subr.mxu0 %v1455_v48 }
 0x29f   : > { %1119 = vmatpush3.msra.mxu0 %v1455_v48 }
 0x2a0   : > { %703 = vrot.lane.b32.xlu1 %v1453_v46, %s1258_s16 }
 0x2a2   : > { %701 = vrot.lane.b32.xlu0 %v1455_v48, %s1258_s16 }
 0x2a4   : > { %725 = vperm.xlu1 %1191, %v717_v49  }
 0x2a6   : > { %720 = vperm.xlu0 %1192, %v716_v50  }
 0x30e   : > { %v711_v51 = vpop.permute.xlu1 %710 }
 0x30f   : > { %1120 = vmatprep.subr.msk.mxu0 %vm1053_vm2, %v711_v51 }
 0x310   : > { %v709_v52 = vpop.permute.xlu0 %708  ;;  %1121 = vmatpush3.msk.msra.mxu0 %vm1053_vm2, %v711_v51 }
 0x311   : > { %1122 = vmatprep.subr.msk.mxu0 %vm1053_vm2, %v709_v52 }
 0x312   : > { %v704_v53 = vpop.permute.xlu1 %703  ;;  %1123 = vmatpush3.msk.msra.mxu0 %vm1053_vm2, %v709_v52 }
 0x313   : > { %1124 = vmatprep.subr.msk.mxu0 %vm1054_vm5, %v704_v53 }
 0x314   : > { %v702_v54 = vpop.permute.xlu0 %701  ;;  %1125 = vmatpush3.msk.msra.mxu0 %vm1054_vm5, %v704_v53 }
 0x315   : > { %1126 = vmatprep.subr.msk.mxu0 %vm1054_vm5, %v702_v54 }
 0x316   : > { %1127 = vmatpush3.msk.msra.mxu0 %vm1054_vm5, %v702_v54 }
 0x317   : > { %1129 = vmatmul.mubr.msk.f32.vlgmr.msra.gmra.mxu0 %vm517_vm4, %v715_v55 }
 0x31f   : > { %v726_v57 = vpop.permute.xlu1 %725 }
 0x321   : > { %v721_v60 = vpop.permute.xlu0 %720 }
 0x3d7   : > { %v1130_v58 = vpop.f32.mrf.mxu0 }
 0x3d8   : > { %v806_v59 = vadd.f32 %v1130_v58, %v726_v57 }
 0x3d9   : > { %v800_v61 = vpop.f32.mrf.mxu0 }
 0x3da   : > { %v810_v62 = vmax.f32 %v806_v59, 0.0  ;;  %v801_v63 = vadd.f32 %v800_v61, %v721_v60 }
 0x3dc   : > { %v809_v0 = vmax.f32 %v801_v63, 0.0  ;;  %819 = vrot.lane.b32.xlu1 %v810_v62, %s1257_s12  ;;  %1131 = vmatprep.subr.mxu1 %v810_v62 }
 0x3dd   : > { %1132 = vmatpush3.msra.mxu1 %v810_v62 }
 0x3de   : > { %817 = vrot.lane.b32.xlu0 %v809_v0, %s1257_s12  ;;  %1133 = vmatprep.subr.mxu1 %v809_v0  ;;  %s1541_s12 = scalar_lea.sflag [#allocation3], %s375_s29 }
 0x3df   : > { %1134 = vmatpush3.msra.mxu1 %v809_v0 }
 0x3e0   : > { %813 = vrot.lane.b32.xlu1 %v810_v62, %s1258_s16 }
 0x3e2   : > { %811 = vrot.lane.b32.xlu0 %v809_v0, %s1258_s16  ;;  %s1193_s16 = scalar_lea.vmem %s1534_s15, 256 }
 0x3e3   : > { %p1194_p11 = scmp.ne.s32.totalorder %s1534_s15, %s1193_s16  ;;  %p1201_p1 = scmp.lt.s32.totalorder %s1199_s0, %s1193_s16 }
 0x3e4   : > { %829 = vperm.xlu1 %1191, %v825_v1  }
 0x3e5   : > { %p1195_p12 = pnand %p1194_p11, %p1360_p5  ;;  %p1202_p2 = por %p1201_p1, %p1200_p0 }
 0x3e6   : > { %834 = vperm.xlu0 %1192, %v826_v2  }
 0x3e7   : > { %p1196_p13 = pneg %p1195_p12 }
 0x3e9   : > { %p1203_p3 = pnand %p1202_p2, %p1196_p13 }
 0x44e   : > { %v820_v3 = vpop.permute.xlu1 %819 }
 0x44f   : > { %1135 = vmatprep.subr.msk.mxu1 %vm1053_vm2, %v820_v3 }
 0x450   : > { %v818_v4 = vpop.permute.xlu0 %817  ;;  %1136 = vmatpush3.msk.msra.mxu1 %vm1053_vm2, %v820_v3 }
 0x451   : > { %1137 = vmatprep.subr.msk.mxu1 %vm1053_vm2, %v818_v4 }
 0x452   : > { %v814_v5 = vpop.permute.xlu1 %813  ;;  %1138 = vmatpush3.msk.msra.mxu1 %vm1053_vm2, %v818_v4 }
 0x453   : > { %1139 = vmatprep.subr.msk.mxu1 %vm1054_vm5, %v814_v5 }
 0x454   : > { %v812_v7 = vpop.permute.xlu0 %811  ;;  %1140 = vmatpush3.msk.msra.mxu1 %vm1054_vm5, %v814_v5 }
 0x455   : > { %1141 = vmatprep.subr.msk.mxu1 %vm1054_vm5, %v812_v7 }
 0x456   : > { %1142 = vmatpush3.msk.msra.mxu1 %vm1054_vm5, %v812_v7 }
 0x457   : > { %1144 = vmatmul.mubr.msk.f32.vlgmr.msra.gmra.mxu1 %vm517_vm4, %v824_v8 }
 0x45f   : > { %v830_v12 = vpop.permute.xlu1 %829 }
 0x461   : > { %v835_v9 = vpop.permute.xlu0 %834 }
 0x517   : > { %v1145_v10 = vpop.f32.mrf.mxu1 }
 0x518   : > { %v915_v11 = vadd.f32 %v1145_v10, %v835_v9 }
 0x519   : > { %v909_v13 = vpop.f32.mrf.mxu1 }
 0x51a   : > { %v919_v14 = vmax.f32 %v915_v11, 0.0  ;;  %v910_v15 = vadd.f32 %v909_v13, %v830_v12 }
 0x51c   : > { %v921_v16 = vadd.f32 %v919_v14, %v1453_v46  ;;  %v918_v17 = vmax.f32 %v910_v15, 0.0 }
 0x51e   : > { %v923_v6 = vmax.f32 %v921_v16, 0.0  ;;  %v920_v18 = vadd.f32 %v918_v17, %v1455_v48 }
 0x520   : > { %925 = vst [vmem:[%s377_s14 + $0x8] sm:$0xff] %v923_v6  ;;  %v922_v19 = vmax.f32 %v920_v18, 0.0 }
 0x522   : > { %924 = vst [vmem:[%s377_s14] sm:$0xff] %v922_v19 }
 0x523   : > { %1206 = shalt.err (!%p1203_p3)
}
 0x524   : > { %s1207_s29 = scalar_lea.hbm %s1539_s25, 256  ;;  %s1211_s24 = scalar_lea.hbm %s1592_s11, 512 }
 0x525   : > { %p1208_p4 = scmp.ne.s32.totalorder %s1539_s25, %s1207_s29  ;;  %p1212_p9 = scmp.lt.s32.totalorder %s1539_s25, %s1592_s11 }
 0x526   : > { %p1213_p10 = scmp.lt.s32.totalorder %s1211_s24, %s1207_s29 }
 0x527   : > { %p1209_p7 = pnand %p1208_p4, %p1360_p5 }
 0x528   : > { %p1214_p11 = por %p1213_p10, %p1212_p9 }
 0x529   : > { %p1210_p8 = pneg %p1209_p7 }
 0x52b   : > { %p1215_p12 = pnand %p1214_p11, %p1210_p8 }
 0x52d   : > { %1218 = shalt.err (!%p1215_p12)
}
 0x52e   : > { %s1260_s0 = smov 128   ;;  %s1261_s16 = smov 8  }
 0x52f   : > { %1146 = dma.vmem_to_hbm [thread:$0]  (%p1360_p5), %s1534_s15, 256, %s1539_s25, %s1541_s12, %s1260_s0, %s1260_s0, %s1261_s16  }
 0x530 PF: > { %p1152_p13 = scmp.ge.s32.totalorder %s1253_s20, 2  ;;  %s955_s13 = sand.u32 1, %s1241_s17  }
 0x531   : > { %s956_s29 = scalar_lea.sflag [#allocation3], %s955_s13 }
 0x532   : > { %p1149_p0 = pnand %p1152_p13, %p1364_p6 }
 0x534   : > { %p1150_p1 = pneg %p1149_p0 }
 0x536   : > { %1236 = dma.done.wait (%p1150_p1), %s956_s29, 256  }
 0x537   : > { %1238 = vsyncadd (%p1150_p1), %s956_s29, 4294967040  ;;  %p21_p2 = scmp.ge.s32.totalorder %s1347_s23, 4   ;;  %s1597_s17 = smov %s1245_s18 }
 0x538   : > { %s1598_s18 = smov %s1249_s19  ;;  %s1599_s19 = smov %s1358_s26 }
 0x539   : > { %s1600_s20 = smov %s1347_s23  ;;  %23 = sbr.rel (!%p21_p2) target bundleno = 5 (0x5), region = 99 }
 0x53e   :  { %961 = vsyncpa [#allocation3], 1 }
 0x53f   :  { %963 = vsyncpa [#allocation3 + $0x1], 1 }

</bundles_post_ra>
